<compile_context>
chip_gen: v7x
topology: tpu7x:2x2x1
jax: 0.10.0
libtpu: 0.0.40
codegen_flags: <defaults>
</compile_context>

<pallas_src>
import functools

import jax
import jax.numpy as jnp
from jax.experimental import pallas as pl
from jax.experimental.pallas import tpu as pltpu


INPUT_SIZE = 406
HIDDEN_SIZE = 128
OUTPUT_SIZE = 2
PADDED_OUT = 128   # 2 -> 128 output lanes: full, unmasked 128-wide store
MIN_TILE = 16      # multiple of 8 (BlockSpec rule) and of bf16 sublane pack


def _cdiv(a, b):
    return -(-a // b)


def _round_up(n, m):
    return ((n + m - 1) // m) * m


def kalmannet_kernel(x_ref, w1_ref, b1_ref, w2_ref, b2_ref, w3_ref, b3_ref,
                     o_ref):
    # In-kernel bf16 cast of the f32 input tile (VPU work, hidden under
    # the DMA / MXU); all dots accumulate in f32.
    x = x_ref[...].astype(jnp.bfloat16)
    # fc1 + relu   (K = 406, masked last MXU chunk)
    h1 = jnp.dot(x, w1_ref[...],
                 preferred_element_type=jnp.float32) + b1_ref[...]
    h1 = jnp.maximum(h1, 0.0).astype(jnp.bfloat16)
    # fc2 + relu
    h2 = jnp.dot(h1, w2_ref[...],
                 preferred_element_type=jnp.float32) + b2_ref[...]
    h2 = jnp.maximum(h2, 0.0).astype(jnp.bfloat16)
    # fc3 (no activation) -> lane-dense padded output block (bf16 store)
    out = jnp.dot(h2, w3_ref[...],
                  preferred_element_type=jnp.float32) + b3_ref[...]
    o_ref[...] = out.astype(o_ref.dtype)


def prepare_params(raw):
    """Cast / pad PyTorch-style (in, out) f32 params for the kernel.

    w1: (406,128) bf16 (no K padding), w2: (128,128) bf16,
    w3: (128,2) -> (128,128) bf16 (zero cols), biases f32 (b3 padded to
    128 lanes). Zero padding contributes nothing to the sliced result."""
    w3 = jnp.pad(raw["w3"], ((0, 0), (0, PADDED_OUT - OUTPUT_SIZE)))
    b3 = jnp.pad(raw["b3"], ((0, 0), (0, PADDED_OUT - OUTPUT_SIZE)))
    return dict(
        w1=raw["w1"].astype(jnp.bfloat16),
        b1=raw["b1"].astype(jnp.float32),
        w2=raw["w2"].astype(jnp.bfloat16),
        b2=raw["b2"].astype(jnp.float32),
        w3=w3.astype(jnp.bfloat16),
        b3=b3.astype(jnp.float32),
    )


def _pick_tile(B, tile_b):
    """Pad-aware batch tile: round user tile to a multiple of MIN_TILE, size
    the per-step tile from cdiv(B, n_steps), and prefer >= 2 grid steps when
    there are enough rows (so both v7x TensorCores get work)."""
    tile_b = max(MIN_TILE, _round_up(int(tile_b), MIN_TILE))
    n = max(1, _cdiv(B, tile_b))
    if n == 1 and B > MIN_TILE:
        n = 2
    tb = _round_up(_cdiv(B, n), MIN_TILE)
    return tb, tb * n, n


@functools.partial(jax.jit, static_argnames=("tile_b",))
def kalmannet_forward(x, kparams, tile_b=1024):
    """x: (B, 406) float32.  kparams: output of prepare_params."""
    B = x.shape[0]
    tb, bp, n_steps = _pick_tile(B, tile_b)

    # Only batch-row zero padding; no feature pad / dtype cast in the wrapper.
    x_p = x if bp == B else jnp.pad(x, ((0, bp - B), (0, 0)))

    const = lambda shape: pl.BlockSpec(shape, lambda i: (0, 0))

    out = pl.pallas_call(
        kalmannet_kernel,
        out_shape=jax.ShapeDtypeStruct((bp, PADDED_OUT), jnp.bfloat16),
        grid=(n_steps,),
        in_specs=[
            pl.BlockSpec((tb, INPUT_SIZE), lambda i: (i, 0)),  # x tile
            const((INPUT_SIZE, HIDDEN_SIZE)),                  # w1 (resident)
            const((1, HIDDEN_SIZE)),                           # b1
            const((HIDDEN_SIZE, HIDDEN_SIZE)),                 # w2
            const((1, HIDDEN_SIZE)),                           # b2
            const((HIDDEN_SIZE, PADDED_OUT)),                  # w3
            const((1, PADDED_OUT)),                            # b3
        ],
        out_specs=pl.BlockSpec((tb, PADDED_OUT), lambda i: (i, 0)),
        compiler_params=pltpu.CompilerParams(
            dimension_semantics=("parallel",)),
    )(x_p, kparams["w1"], kparams["b1"], kparams["w2"], kparams["b2"],
      kparams["w3"], kparams["b3"])

    # Drop batch padding and the padded output lanes; back to f32.
    return out[:B, :OUTPUT_SIZE].astype(jnp.float32)


def init_params(key):
    """Deterministic init mimicking PyTorch's default Linear init:
    U(-1/sqrt(fan_in), 1/sqrt(fan_in)). Weights stored as (in, out), f32."""
    def linear(key, fan_in, fan_out):
        kw, kb = jax.random.split(key)
        bound = 1.0 / jnp.sqrt(jnp.float32(fan_in))
        w = jax.random.uniform(kw, (fan_in, fan_out), jnp.float32,
                               minval=-bound, maxval=bound)
        b = jax.random.uniform(kb, (1, fan_out), jnp.float32,
                               minval=-bound, maxval=bound)
        return w, b

    k1, k2, k3 = jax.random.split(key, 3)
    w1, b1 = linear(k1, INPUT_SIZE, HIDDEN_SIZE)
    w2, b2 = linear(k2, HIDDEN_SIZE, HIDDEN_SIZE)
    w3, b3 = linear(k3, HIDDEN_SIZE, OUTPUT_SIZE)
    return dict(w1=w1, b1=b1, w2=w2, b2=b2, w3=w3, b3=b3)


def reference_forward(x, p):
    """Pure-f32 reference with the original module's semantics."""
    h1 = jnp.maximum(x @ p["w1"] + p["b1"], 0.0)
    h2 = jnp.maximum(h1 @ p["w2"] + p["b2"], 0.0)
    return h2 @ p["w3"] + p["b3"]


if __name__ == "__main__":
    key = jax.random.PRNGKey(0)
    k_params, k_x1, k_x2 = jax.random.split(key, 3)

    raw_params = init_params(k_params)
    kparams = prepare_params(raw_params)

    # Case 1: small batch (single grid step).
    b1 = 8
    x1 = jax.random.normal(k_x1, (b1, INPUT_SIZE), jnp.float32)
    out1 = jax.block_until_ready(kalmannet_forward(x1, kparams))
    ref1 = reference_forward(x1, raw_params)
    assert out1.shape == (b1, OUTPUT_SIZE), out1.shape
    assert jnp.allclose(out1, ref1, atol=5e-2, rtol=5e-2), \
        f"max abs err {jnp.max(jnp.abs(out1 - ref1))}"

    # Case 2: ragged batch, multiple grid steps (exercise tiling/padding).
    b2 = 37
    x2 = jax.random.normal(k_x2, (b2, INPUT_SIZE), jnp.float32)
    out2 = jax.block_until_ready(kalmannet_forward(x2, kparams, tile_b=16))
    ref2 = reference_forward(x2, raw_params)
    assert out2.shape == (b2, OUTPUT_SIZE), out2.shape
    assert jnp.allclose(out2, ref2, atol=5e-2, rtol=5e-2), \
        f"max abs err {jnp.max(jnp.abs(out2 - ref2))}"

    print("KERNEL_OK")
</pallas_src>

<mosaic_0001>
module attributes {stable_mosaic.version = 11 : i64} {
  func.func @kalmannet_kernel(%arg0: i32, %arg1: memref<16x406xf32, #tpu.memory_space<vmem>>, %arg2: memref<406x128xbf16, #tpu.memory_space<vmem>>, %arg3: memref<1x128xf32, #tpu.memory_space<vmem>>, %arg4: memref<128x128xbf16, #tpu.memory_space<vmem>>, %arg5: memref<1x128xf32, #tpu.memory_space<vmem>>, %arg6: memref<128x128xbf16, #tpu.memory_space<vmem>>, %arg7: memref<1x128xf32, #tpu.memory_space<vmem>>, %arg8: memref<16x128xbf16, #tpu.memory_space<vmem>>) attributes {dimension_semantics = [#tpu.dimension_semantics<parallel>], iteration_bounds = array<i64: 1>, scalar_prefetch = 0 : i64, scratch_operands = 0 : i64, tpu.core_type = #tpu.core_type<tc>, window_params = [{transform_indices = @transform_0, window_bounds = array<i64: 16, 406>}, {pipeline_mode = #tpu.pipeline_mode<synchronous>, transform_indices = @transform_1, window_bounds = array<i64: 406, 128>}, {pipeline_mode = #tpu.pipeline_mode<synchronous>, transform_indices = @transform_2, window_bounds = array<i64: 1, 128>}, {pipeline_mode = #tpu.pipeline_mode<synchronous>, transform_indices = @transform_3, window_bounds = array<i64: 128, 128>}, {pipeline_mode = #tpu.pipeline_mode<synchronous>, transform_indices = @transform_4, window_bounds = array<i64: 1, 128>}, {pipeline_mode = #tpu.pipeline_mode<synchronous>, transform_indices = @transform_5, window_bounds = array<i64: 128, 128>}, {pipeline_mode = #tpu.pipeline_mode<synchronous>, transform_indices = @transform_6, window_bounds = array<i64: 1, 128>}, {transform_indices = @transform_7, window_bounds = array<i64: 16, 128>}]} {
    %c0 = arith.constant 0 : index
    %c0_0 = arith.constant 0 : index
    %0 = vector.load %arg1[%c0, %c0_0] : memref<16x406xf32, #tpu.memory_space<vmem>>, vector<16x406xf32>
    %1 = arith.truncf %0 : vector<16x406xf32> to vector<16x406xbf16>
    %c0_1 = arith.constant 0 : index
    %c0_2 = arith.constant 0 : index
    %2 = vector.load %arg2[%c0_1, %c0_2] : memref<406x128xbf16, #tpu.memory_space<vmem>>, vector<406x128xbf16>
    %cst = arith.constant dense<0.000000e+00> : vector<16x128xf32>
    %3 = tpu.matmul %1, %2, %cst {dimension_numbers = #tpu.dot_dimension_numbers<[1], [0], [0], [1], [0, 0, 1, 1], [], []>} : vector<16x406xbf16>, vector<406x128xbf16>, vector<16x128xf32> -> vector<16x128xf32>
    %c0_3 = arith.constant 0 : index
    %c0_4 = arith.constant 0 : index
    %4 = vector.load %arg3[%c0_3, %c0_4] : memref<1x128xf32, #tpu.memory_space<vmem>>, vector<1x128xf32>
    %5 = vector.broadcast %4 : vector<1x128xf32> to vector<16x128xf32>
    %6 = arith.addf %3, %5 : vector<16x128xf32>
    %cst_5 = arith.constant 0.000000e+00 : f32
    %7 = vector.broadcast %cst_5 : f32 to vector<16x128xf32>
    %8 = arith.maximumf %6, %7 : vector<16x128xf32>
    %9 = arith.truncf %8 : vector<16x128xf32> to vector<16x128xbf16>
    %c0_6 = arith.constant 0 : index
    %c0_7 = arith.constant 0 : index
    %10 = vector.load %arg4[%c0_6, %c0_7] : memref<128x128xbf16, #tpu.memory_space<vmem>>, vector<128x128xbf16>
    %cst_8 = arith.constant dense<0.000000e+00> : vector<16x128xf32>
    %11 = tpu.matmul %9, %10, %cst_8 {dimension_numbers = #tpu.dot_dimension_numbers<[1], [0], [0], [1], [0, 0, 1, 1], [], []>} : vector<16x128xbf16>, vector<128x128xbf16>, vector<16x128xf32> -> vector<16x128xf32>
    %c0_9 = arith.constant 0 : index
    %c0_10 = arith.constant 0 : index
    %12 = vector.load %arg5[%c0_9, %c0_10] : memref<1x128xf32, #tpu.memory_space<vmem>>, vector<1x128xf32>
    %13 = vector.broadcast %12 : vector<1x128xf32> to vector<16x128xf32>
    %14 = arith.addf %11, %13 : vector<16x128xf32>
    %cst_11 = arith.constant 0.000000e+00 : f32
    %15 = vector.broadcast %cst_11 : f32 to vector<16x128xf32>
    %16 = arith.maximumf %14, %15 : vector<16x128xf32>
    %17 = arith.truncf %16 : vector<16x128xf32> to vector<16x128xbf16>
    %c0_12 = arith.constant 0 : index
    %c0_13 = arith.constant 0 : index
    %18 = vector.load %arg6[%c0_12, %c0_13] : memref<128x128xbf16, #tpu.memory_space<vmem>>, vector<128x128xbf16>
    %cst_14 = arith.constant dense<0.000000e+00> : vector<16x128xf32>
    %19 = tpu.matmul %17, %18, %cst_14 {dimension_numbers = #tpu.dot_dimension_numbers<[1], [0], [0], [1], [0, 0, 1, 1], [], []>} : vector<16x128xbf16>, vector<128x128xbf16>, vector<16x128xf32> -> vector<16x128xf32>
    %c0_15 = arith.constant 0 : index
    %c0_16 = arith.constant 0 : index
    %20 = vector.load %arg7[%c0_15, %c0_16] : memref<1x128xf32, #tpu.memory_space<vmem>>, vector<1x128xf32>
    %21 = vector.broadcast %20 : vector<1x128xf32> to vector<16x128xf32>
    %22 = arith.addf %19, %21 : vector<16x128xf32>
    %23 = arith.truncf %22 : vector<16x128xf32> to vector<16x128xbf16>
    %c0_17 = arith.constant 0 : index
    %c0_18 = arith.constant 0 : index
    %24 = vector.load %arg8[%c0_17, %c0_18] : memref<16x128xbf16, #tpu.memory_space<vmem>>, vector<16x128xbf16>
    tpu.vector_store %arg8[%c0_17, %c0_18], %23 {strides = array<i32>} : memref<16x128xbf16, #tpu.memory_space<vmem>>, vector<16x128xbf16>,
    return
  }
  func.func @transform_0(%arg0: i32) -> (i32, i32) {
    %c0_i32 = arith.constant 0 : i32
    %c0_i32_0 = arith.constant 0 : i32
    return %arg0, %c0_i32 : i32, i32
  }
  func.func @transform_1(%arg0: i32) -> (i32, i32) {
    %c0_i32 = arith.constant 0 : i32
    %c0_i32_0 = arith.constant 0 : i32
    %c0_i32_1 = arith.constant 0 : i32
    return %c0_i32, %c0_i32_0 : i32, i32
  }
  func.func @transform_2(%arg0: i32) -> (i32, i32) {
    %c0_i32 = arith.constant 0 : i32
    %c0_i32_0 = arith.constant 0 : i32
    %c0_i32_1 = arith.constant 0 : i32
    return %c0_i32, %c0_i32_0 : i32, i32
  }
  func.func @transform_3(%arg0: i32) -> (i32, i32) {
    %c0_i32 = arith.constant 0 : i32
    %c0_i32_0 = arith.constant 0 : i32
    %c0_i32_1 = arith.constant 0 : i32
    return %c0_i32, %c0_i32_0 : i32, i32
  }
  func.func @transform_4(%arg0: i32) -> (i32, i32) {
    %c0_i32 = arith.constant 0 : i32
    %c0_i32_0 = arith.constant 0 : i32
    %c0_i32_1 = arith.constant 0 : i32
    return %c0_i32, %c0_i32_0 : i32, i32
  }
  func.func @transform_5(%arg0: i32) -> (i32, i32) {
    %c0_i32 = arith.constant 0 : i32
    %c0_i32_0 = arith.constant 0 : i32
    %c0_i32_1 = arith.constant 0 : i32
    return %c0_i32, %c0_i32_0 : i32, i32
  }
  func.func @transform_6(%arg0: i32) -> (i32, i32) {
    %c0_i32 = arith.constant 0 : i32
    %c0_i32_0 = arith.constant 0 : i32
    %c0_i32_1 = arith.constant 0 : i32
    return %c0_i32, %c0_i32_0 : i32, i32
  }
  func.func @transform_7(%arg0: i32) -> (i32, i32) {
    %c0_i32 = arith.constant 0 : i32
    %c0_i32_0 = arith.constant 0 : i32
    return %arg0, %c0_i32 : i32, i32
  }
}

</mosaic_0001>

<bundles_post_ra>
// kernel: kalmannet_forward.1
= control target key start
LH: loop header
LB: loop body
LE: loop exit
PB: predicated region body
PF: predicated region fallthrough
CT: control target
= control target key end

     0   :  { %12 = vsyncpa [#allocation3], 0  ;;  %s1005_s0 = inlined_call_operand.vmem [shape: f32[16,406], index: 0, kind: input, shape index: {}]   ;;  %s1006_s1 = inlined_call_operand.hbm [shape: bf16[406,128], index: 1, kind: input, shape index: {}]   ;;  %s1007_s2 = inlined_call_operand.vmem [shape: f32[1,128], index: 2, kind: input, shape index: {}]   ;;  %s1008_s3 = inlined_call_operand.vmem [shape: bf16[128,128], index: 3, kind: input, shape index: {}]   ;;  %s1009_s4 = inlined_call_operand.vmem [shape: f32[1,128], index: 4, kind: input, shape index: {}]   ;;  %s1010_s5 = inlined_call_operand.hbm [shape: bf16[128,128], index: 5, kind: input, shape index: {}]   ;;  %s1011_s6 = inlined_call_operand.vmem [shape: f32[1,128], index: 6, kind: input, shape index: {}]   ;;  %s1012_s7 = inlined_call_operand.vmem [shape: bf16[16,128], index: 7, kind: output, shape index: {}]  }
   0x1   :  { %13 = vsyncpa [#allocation5], 0  ;;  %s846_s24 = smov [#allocation2]   ;;  %s798_s28 = scalar_lea.hbm %s1006_s1, 3264 }
   0x2   :  { %s21_s25 = sshll.u32 %s846_s24, 4  ;;  %p799_p0 = scmp.ne.s32.totalorder %s1006_s1, %s798_s28  ;;  %s22_s25 = int_to_ptr.vmem [resolvable:$true] %s21_s25 }
   0x3   :  { %p802_p1 = scmp.lt.u32.totalorder %s798_s28, %s1006_s1 }
   0x5   :  { %p804_p2 = pnand %p802_p1, %p799_p0 }
   0x7   :  { %807 = shalt.err (!%p804_p2)
}
   0x8   :  { %s808_s10 = scalar_lea.vmem %s22_s25, 3264  ;;  %p813_p4 = scmp.lt.s32.totalorder %s22_s25, %s22_s25 }
   0x9   :  { %p809_p3 = scmp.ne.s32.totalorder %s22_s25, %s808_s10  ;;  %p814_p5 = scmp.lt.s32.totalorder %s808_s10, %s808_s10 }
   0xb   :  { %p815_p6 = por %p814_p5, %p813_p4 }
   0xd   :  { %p816_p7 = pnand %p815_p6, %p809_p3 }
   0xf   :  { %819 = shalt.err (!%p816_p7)
}
  0x10   :  { %s847_s11 = smov 64   ;;  %s848_s12 = smov 4  }
  0x11   :  { %27 = dma.hbm_to_vmem [thread:$0]  %s1006_s1, 3264, %s22_s25, [#allocation3], %s847_s11, %s847_s11, %s848_s12  }
  0x12   :  { %s849_s15 = smov [#allocation4]   ;;  %s820_s19 = scalar_lea.hbm %s1010_s5, 1024 }
  0x13   :  { %s39_s16 = sshll.u32 %s849_s15, 4  ;;  %p821_p8 = scmp.ne.s32.totalorder %s1010_s5, %s820_s19  ;;  %s40_s16 = int_to_ptr.vmem [resolvable:$true] %s39_s16 }
  0x14   :  { %p824_p9 = scmp.lt.u32.totalorder %s820_s19, %s1010_s5 }
  0x16   :  { %p826_p10 = pnand %p824_p9, %p821_p8 }
  0x18   :  { %829 = shalt.err (!%p826_p10)
}
  0x19   :  { %s830_s24 = scalar_lea.vmem %s40_s16, 1024  ;;  %p835_p12 = scmp.lt.s32.totalorder %s40_s16, %s40_s16 }
  0x1a   :  { %p831_p11 = scmp.ne.s32.totalorder %s40_s16, %s830_s24  ;;  %p836_p13 = scmp.lt.s32.totalorder %s830_s24, %s830_s24 }
  0x1c   :  { %p837_p0 = por %p836_p13, %p835_p12 }
  0x1e   :  { %p838_p1 = pnand %p837_p0, %p831_p11 }
  0x20   :  { %841 = shalt.err (!%p838_p1)
}
  0x21   :  { %45 = dma.hbm_to_vmem [thread:$0]  %s1010_s5, 1024, %s40_s16, [#allocation5], %s847_s11, %s847_s11, %s848_s12  }
  0x22   :  { %842 = dma.done.wait [#allocation3], 3264  }
  0x23   :  { %843 = vsyncadd [#allocation3], 4294964032 }
  0x24   :  { %844 = dma.done.wait [#allocation5], 1024  }
  0x25   :  { %845 = vsyncadd [#allocation5], 4294966272  ;;  %v850_v0 = vmov 0   ;;  %v756_v1 = vld [vmem:[#allocation2 + $0x40] sm:$0xff]   ;;  %v759_v4 = vld [vmem:[#allocation2 + $0x48] sm:$0xff]   ;;  %vm278_vm0 = vcmask 179200  }
  0x26   :  { %327 = vmatprep.subr.bf16.mxu1 %v850_v0  ;;  %v757_v2 = vld [vmem:[#allocation2 + $0x80] sm:$0xff]   ;;  %669 = vmatprep.subr.bf16.mxu0 %v756_v1  ;;  %v760_v5 = vld [vmem:[#allocation2 + $0x88] sm:$0xff]   ;;  %v762_v7 = vld [vmem:[#allocation2 + $0x50] sm:$0xff]   ;;  %vm282_vm1 = vcmask 1042432   ;;  %v851_v40 = vmov 0.0   ;;  %vm852_vm2 = vmmov 0  }
  0x27   :  { %v758_v3 = vld [vmem:[#allocation2] sm:$0xff]   ;;  %328 = vmatpush1.bf16.msra.mxu1 %v757_v2  ;;  %v761_v6 = vld [vmem:[#allocation2 + $0x8] sm:$0xff]   ;;  %v763_v8 = vld [vmem:[#allocation2 + $0x90] sm:$0xff]  }
  0x28   :  { %670 = vmatpush3.bf16.msra.mxu0 %v758_v3  ;;  %329 = vmatprep.subr.bf16.mxu1 %v850_v0  ;;  %v764_v9 = vld [vmem:[#allocation2 + $0x10] sm:$0xff]   ;;  %v765_v10 = vld [vmem:[#allocation2 + $0x58] sm:$0xff]   ;;  %v768_v13 = vld [vmem:[#allocation2 + $0x60] sm:$0xff]  }
  0x29   :  { %671 = vmatprep.subr.bf16.mxu0 %v759_v4  ;;  %v766_v11 = vld [vmem:[#allocation2 + $0x98] sm:$0xff]   ;;  %v769_v14 = vld [vmem:[#allocation2 + $0xa0] sm:$0xff]   ;;  %v771_v16 = vld [vmem:[#allocation2 + $0x68] sm:$0xff]  }
  0x2a   :  { %v767_v12 = vld [vmem:[#allocation2 + $0x18] sm:$0xff]   ;;  %v770_v15 = vld [vmem:[#allocation2 + $0x20] sm:$0xff]   ;;  %v772_v17 = vld [vmem:[#allocation2 + $0xa8] sm:$0xff]  }
  0x2b   :  { %330 = vmatpush1.bf16.msra.mxu1 %v760_v5  ;;  %v773_v18 = vld [vmem:[#allocation2 + $0x28] sm:$0xff]   ;;  %v774_v19 = vld [vmem:[#allocation2 + $0x70] sm:$0xff]   ;;  %v777_v22 = vld [vmem:[#allocation2 + $0x78] sm:$0xff]  }
  0x2c   :  { %672 = vmatpush3.bf16.msra.mxu0 %v761_v6  ;;  %331 = vmatprep.subr.bf16.mxu1 %v850_v0  ;;  %v775_v20 = vld [vmem:[#allocation2 + $0xb0] sm:$0xff]   ;;  %v56_v23 = vld [vmem:[%s1005_s0 + $0x8] sm:$0xff]  ;;  %v778_v25 = vld [vmem:[#allocation2 + $0xb8] sm:$0xff]  }
  0x2d   :  { %673 = vmatprep.subr.bf16.mxu0 %v762_v7  ;;  %v776_v21 = vld [vmem:[#allocation2 + $0x30] sm:$0xff]   ;;  %v60_v24 = vld [vmem:[%s1005_s0 + $0x28] sm:$0xff]  ;;  %v779_v27 = vld [vmem:[#allocation2 + $0x38] sm:$0xff]  }
  0x2e   :  { %v64_v26 = vpack.c.bf16 %v60_v24, %v56_v23  ;;  %v55_v28 = vld [vmem:[%s1005_s0] sm:$0xff]  ;;  %v781_v29 = vld [vmem:[#allocation2 + $0xc8] ss:$0 sps:$4 sm:$0x77]   ;;  %v58_v30 = vld [vmem:[%s1005_s0 + $0x18] sm:$0xff] }
  0x2f   :  { %332 = vmatpush1.bf16.msra.mxu1 %v763_v8  ;;  %v62_v31 = vld [vmem:[%s1005_s0 + $0x38] sm:$0xff]  ;;  %v59_v32 = vld [vmem:[%s1005_s0 + $0x20] sm:$0xff]  ;;  %v284_v36 = vsel %vm282_vm1, %v781_v29, 0  ;;  %v57_v38 = vld [vmem:[%s1005_s0 + $0x10] sm:$0xff] }
  0x30   :  { %674 = vmatpush3.bf16.msra.mxu0 %v764_v9  ;;  %333 = vmatprep.subr.bf16.mxu1 %v850_v0  ;;  %v66_v33 = vpack.c.bf16 %v62_v31, %v58_v30  ;;  %v63_v34 = vpack.c.bf16 %v59_v32, %v55_v28  ;;  %v780_v35 = vld [vmem:[#allocation2 + $0xc0] sm:$0xff]   ;;  %v61_v39 = vld [vmem:[%s1005_s0 + $0x30] sm:$0xff]  ;;  %v783_v41 = vld [vmem:[%s1008_s3 + $0x8] sm:$0xff]  }
  0x31   :  { %675 = vmatprep.subr.bf16.mxu0 %v765_v10  ;;  %318 = vmatprep.mubr.bf16.mxu0 %v64_v26  ;;  %v782_v37 = vld [vmem:[%s1008_s3] sm:$0xff]   ;;  %v65_v42 = vpack.c.bf16 %v61_v39, %v57_v38  ;;  %v784_v43 = vld [vmem:[%s1008_s3 + $0x10] sm:$0xff]   ;;  %v785_v44 = vld [vmem:[%s1008_s3 + $0x18] sm:$0xff]  }
  0x32   :  { %641 = vmatprep.mubr.msk.bf16.mxu1 %vm278_vm0, %v66_v33  ;;  %v786_v45 = vld [vmem:[%s1008_s3 + $0x20] sm:$0xff]   ;;  %v787_v46 = vld [vmem:[%s1008_s3 + $0x28] sm:$0xff]   ;;  %v788_v47 = vld [vmem:[%s1008_s3 + $0x30] sm:$0xff]  }
  0x33   :  { %334 = vmatpush1.bf16.msra.mxu1 %v766_v11  ;;  %v789_v48 = vld [vmem:[%s1008_s3 + $0x38] sm:$0xff]   ;;  %v790_v49 = vld [vmem:[#allocation4] sm:$0xff]   ;;  %v793_v52 = vld [vmem:[#allocation4 + $0x18] sm:$0xff]  }
  0x34   :  { %676 = vmatpush3.bf16.msra.mxu0 %v767_v12  ;;  %335 = vmatprep.subr.bf16.mxu1 %v850_v0  ;;  %v791_v50 = vld [vmem:[#allocation4 + $0x8] sm:$0xff]   ;;  %v792_v51 = vld [vmem:[#allocation4 + $0x10] sm:$0xff]   ;;  %v794_v53 = vld [vmem:[#allocation4 + $0x20] sm:$0xff]  }
  0x35   :  { %677 = vmatprep.subr.bf16.mxu0 %v768_v13  ;;  %v795_v54 = vld [vmem:[#allocation4 + $0x28] sm:$0xff]   ;;  %v614_v57 = vld [vmem:[%s1007_s2] ss:$0 sm:$0xff]  ;;  %v797_v10 = vld [vmem:[#allocation4 + $0x38] sm:$0xff]  }
  0x36   :  { %v796_v9 = vld [vmem:[#allocation4 + $0x30] sm:$0xff]  }
  0x37   :  { %336 = vmatpush1.bf16.msra.mxu1 %v769_v14  ;;  %v642_v11 = vld [vmem:[%s1009_s4] ss:$0 sm:$0xff] }
  0x38   :  { %678 = vmatpush3.bf16.msra.mxu0 %v770_v15  ;;  %337 = vmatprep.subr.bf16.mxu1 %v850_v0 }
  0x39   :  { %679 = vmatprep.subr.bf16.mxu0 %v771_v16 }
  0x3b   :  { %338 = vmatpush1.bf16.msra.mxu1 %v772_v17 }
  0x3c   :  { %680 = vmatpush3.bf16.msra.mxu0 %v773_v18  ;;  %339 = vmatprep.subr.bf16.mxu1 %v850_v0 }
  0x3d   :  { %681 = vmatprep.subr.bf16.mxu0 %v774_v19 }
  0x3f   :  { %340 = vmatpush1.bf16.msra.mxu1 %v775_v20 }
  0x40   :  { %682 = vmatpush3.bf16.msra.mxu0 %v776_v21  ;;  %341 = vmatprep.subr.bf16.mxu1 %v850_v0  ;;  %v651_v21 = vld [vmem:[%s1011_s6] ss:$0 sm:$0xff] }
  0x41   :  { %683 = vmatprep.subr.bf16.mxu0 %v777_v22 }
  0x43   :  { %342 = vmatpush1.bf16.msra.mxu1 %v778_v25 }
  0x44   :  { %684 = vmatpush3.bf16.msra.mxu0 %v779_v27  ;;  %343 = vmatprep.subr.bf16.mxu1 %v850_v0 }
  0x45   :  { %709 = vmatprep.subr.bf16.mxu0 %v851_v40 }
  0x47   :  { %319 = vmatmul.mubr.bf16.vlgmr.msra.gmra.mrb[0].mxu0 %v63_v34  ;;  %344 = vmatpush1.bf16.msra.mxu1 %v780_v35 }
  0x48   :  { %345 = vmatprep.subr.bf16.mxu1 %v850_v0  ;;  %710 = vmatpush3.bf16.msra.mxu0 %v782_v37 }
  0x49   :  { %711 = vmatprep.subr.bf16.mxu0 %v851_v40  ;;  %725 = vmatprep.mubr.msk.bf16.mxu0 %vm852_vm2, %v851_v40 }
  0x4b   :  { %346 = vmatpush1.bf16.msra.mxu1 %v284_v36 }
  0x4c   :  { %712 = vmatpush3.bf16.msra.mxu0 %v783_v41  ;;  %729 = vmatprep.subr.bf16.mxu1 %v851_v40 }
  0x4d   :  { %713 = vmatprep.subr.bf16.mxu0 %v851_v40 }
  0x4e   :  { %360 = vmatmul.mubr.bf16.vlgmr.msra.gmra.mrb[0].mxu1 %v65_v42 }
  0x4f   :  { %745 = vmatprep.mubr.msk.bf16.mxu1 %vm852_vm2, %v851_v40  ;;  %730 = vmatpush3.bf16.msra.mxu1 %v790_v49 }
  0x50   :  { %714 = vmatpush3.bf16.msra.mxu0 %v784_v43  ;;  %731 = vmatprep.subr.bf16.mxu1 %v851_v40 }
  0x51   :  { %715 = vmatprep.subr.bf16.mxu0 %v851_v40 }
  0x53   :  { %732 = vmatpush3.bf16.msra.mxu1 %v791_v50 }
  0x54   :  { %716 = vmatpush3.bf16.msra.mxu0 %v785_v44  ;;  %733 = vmatprep.subr.bf16.mxu1 %v851_v40 }
  0x55   :  { %717 = vmatprep.subr.bf16.mxu0 %v851_v40 }
  0x57   :  { %734 = vmatpush3.bf16.msra.mxu1 %v792_v51 }
  0x58   :  { %718 = vmatpush3.bf16.msra.mxu0 %v786_v45  ;;  %735 = vmatprep.subr.bf16.mxu1 %v851_v40 }
  0x59   :  { %719 = vmatprep.subr.bf16.mxu0 %v851_v40 }
  0x5b   :  { %736 = vmatpush3.bf16.msra.mxu1 %v793_v52 }
  0x5c   :  { %720 = vmatpush3.bf16.msra.mxu0 %v787_v46  ;;  %737 = vmatprep.subr.bf16.mxu1 %v851_v40 }
  0x5d   :  { %721 = vmatprep.subr.bf16.mxu0 %v851_v40 }
  0x5f   :  { %738 = vmatpush3.bf16.msra.mxu1 %v794_v53 }
  0x60   :  { %722 = vmatpush3.bf16.msra.mxu0 %v788_v47  ;;  %739 = vmatprep.subr.bf16.mxu1 %v851_v40 }
  0x61   :  { %723 = vmatprep.subr.bf16.mxu0 %v851_v40 }
  0x63   :  { %740 = vmatpush3.bf16.msra.mxu1 %v795_v54 }
  0x64   :  { %724 = vmatpush3.bf16.msra.mxu0 %v789_v48  ;;  %741 = vmatprep.subr.bf16.mxu1 %v851_v40 }
  0x67   :  { %742 = vmatpush3.bf16.msra.mxu1 %v796_v9 }
  0x68   :  { %743 = vmatprep.subr.bf16.mxu1 %v851_v40 }
  0x6b   :  { %744 = vmatpush3.bf16.msra.mxu1 %v797_v10 }
 0x11a   :  { %v685_v55 = vpop.f32.mrb[0].mxu0 }
 0x11b   :  { %v686_v56 = vpop.f32.mrb[1].mxu0 }
 0x11c   :  { %v687_v58 = vadd.f32 %v686_v56, %v685_v55  ;;  %v688_v59 = vpop.f32.mrb[2].mxu0 }
 0x11d   :  { %v689_v60 = vpop.f32.mrb[3].mxu0 }
 0x11e   :  { %v690_v61 = vadd.f32 %v689_v60, %v688_v59  ;;  %v321_v62 = vadd.f32 %v687_v58, %v614_v57 }
 0x120   :  { %v324_v2 = vadd.f32 %v690_v61, %v614_v57 }
 0x121   :  { %v361_v63 = vpop.f32.mrb[0].mxu1 }
 0x122   :  { %v362_v0 = vadd.f32 %v361_v63, %v321_v62  ;;  %v363_v1 = vpop.f32.mrb[1].mxu1 }
 0x123   :  { %v364_v3 = vpop.f32.mrb[2].mxu1 }
 0x124   :  { %v365_v4 = vadd.f32 %v364_v3, %v324_v2  ;;  %v366_v5 = vpop.f32.mrb[3].mxu1  ;;  %v368_v6 = vmax.f32 %v362_v0, 0.0 }
 0x126   :  { %v369_v7 = vmax.f32 %v365_v4, 0.0 }
 0x128   :  { %v370_v8 = vpack.c.bf16 %v369_v7, %v368_v6 }
 0x12a   :  { %726 = vmatmul.mubr.bf16.vlgmr.msra.gmra.mrb[4].mxu0 %v370_v8 }
 0x1fd   :  { %v476_v12 = vpop.f32.mrb[4].mxu0 }
 0x1fe   :  { %v477_v13 = vadd.f32 %v642_v11, %v476_v12  ;;  %v727_v14 = vpop.f32.mrb[5].mxu0 }
 0x1ff   :  { %v479_v15 = vpop.f32.mrb[6].mxu0 }
 0x200   :  { %v480_v16 = vadd.f32 %v642_v11, %v479_v15  ;;  %v728_v17 = vpop.f32.mrb[7].mxu0  ;;  %v483_v18 = vmax.f32 %v477_v13, 0.0 }
 0x202   :  { %v484_v19 = vmax.f32 %v480_v16, 0.0 }
 0x204   :  { %v485_v20 = vpack.c.bf16 %v484_v19, %v483_v18 }
 0x206   :  { %746 = vmatmul.mubr.bf16.vlgmr.msra.gmra.mrb[4].mxu1 %v485_v20 }
 0x2d9   :  { %v591_v22 = vpop.f32.mrb[4].mxu1 }
 0x2da   :  { %v747_v23 = vpop.f32.mrb[5].mxu1  ;;  %v592_v25 = vadd.f32 %v651_v21, %v591_v22 }
 0x2db   :  { %v594_v24 = vpop.f32.mrb[6].mxu1 }
 0x2dc   :  { %v595_v26 = vadd.f32 %v651_v21, %v594_v24  ;;  %v748_v27 = vpop.f32.mrb[7].mxu1 }
 0x2de   :  { %v667_v28 = vpack.c.bf16 %v595_v26, %v592_v25 }
 0x2e0   :  { %668 = vst [vmem:[%s1012_s7] sm:$0xff] %v667_v28  }
 0x2e1   :  { %612 = vsyncpa [#allocation3], 1 }
 0x2e2   :  { %613 = vsyncpa [#allocation5], 1 }

</bundles_post_ra>
